<compile_context>
chip_gen: v7x
topology: tpu7x:2x2x1
jax: 0.10.0
libtpu: 0.0.40
codegen_flags: <defaults>
</compile_context>

<pallas_src>
import functools

import jax
import jax.numpy as jnp
from jax.experimental import pallas as pl
from jax.experimental.pallas import tpu as pltpu

_X_BLOCK_BYTES = 1 << 20  # ~1 MiB (f32-equivalent) per x block


def _round_up(x, m):
    return (x + m - 1) // m * m


def _ce_sum_kernel(x_ref, t_ref, o_ref, *, n_pixels, ts, nblk, needs_mask):
    """x_ref: (1, C, TS, 128) logits block; t_ref: (1, 1, TS, 128) int32 targets;
    o_ref: (1, 1, TS, 128) f32 per-(batch, split) nll accumulator, resident
    across the pixel-block (arbitrary) grid axis."""
    j = pl.program_id(2)

    @pl.when(j == 0)
    def _():
        o_ref[...] = jnp.zeros_like(o_ref)

    x = x_ref[...].astype(jnp.float32)                       # (1, C, TS, 128)
    t = t_ref[...]                                           # (1, 1, TS, 128)
    c = x.shape[1]

    # softmax over channels (== dim=1 of the original NCHW tensor).
    # C is a leading, non-tiled axis -> these reduces are VPU elementwise ops.
    m = jnp.max(x, axis=1, keepdims=True)                    # (1, 1, TS, 128)
    e = jnp.exp(x - m)                                       # (1, C, TS, 128)
    p = e * pl.reciprocal(jnp.sum(e, axis=1, keepdims=True), approx=True)

    # cross_entropy applies log_softmax to its input (the probs); since p <= 1
    # the logsumexp needs no max-shift:  nll = lse(p) - p[target].
    lse = jnp.log(jnp.sum(jnp.exp(p), axis=1, keepdims=True))    # (1, 1, TS, 128)

    # Gather p[target] with a static channel unroll (C is static & small):
    # C cheap where/select ops instead of a C*TS*128 iota + compare.
    p_t = jnp.zeros_like(lse)
    for cls in range(c):
        p_t = jnp.where(t == cls, p[:, cls:cls + 1], p_t)

    nll = lse - p_t                                              # (1, 1, TS, 128)

    if needs_mask:
        # Ragged tail / partial edge blocks: mask by global pixel index.
        # Keep the *select* form (jnp.where) so garbage lanes can't propagate.
        pblk = pl.program_id(1)
        row0 = (pblk * nblk + j) * ts
        row = row0 + jax.lax.broadcasted_iota(jnp.int32, (1, 1, ts, 128), 2)
        lane = jax.lax.broadcasted_iota(jnp.int32, (1, 1, ts, 128), 3)
        nll = jnp.where(row * 128 + lane < n_pixels, nll, 0.0)

    o_ref[...] += nll


@jax.jit
def lovasz_softmax_loss(pred, target):
    """pred: (N, C, H, W) float; target: (N, H, W) int. Returns scalar f32 loss."""
    N, C, H, W = pred.shape
    HW = H * W
    P = N * HW

    hw_pad = _round_up(HW, 128)
    R = hw_pad // 128                                 # 128-pixel rows

    # Free, contiguous reshapes — no HBM transpose, keep pred's dtype.
    x = pred.reshape(N, C, HW)
    t = target.reshape(N, 1, HW).astype(jnp.int32)
    if hw_pad != HW:
        # Rare path: the (rows, 128) re-layout below needs HW % 128 == 0, so a
        # small lane-granularity pad is unavoidable; padded pixels are masked
        # in-kernel.  (Aligned case takes no pad at all.)
        x = jnp.pad(x, ((0, 0), (0, 0), (0, hw_pad - HW)))
        t = jnp.pad(t, ((0, 0), (0, 0), (0, hw_pad - HW)))
    # Pixels fill full (8,128) tiles; C is a leading, non-tiled axis.
    x = x.reshape(N, C, R, 128)
    t = t.reshape(N, 1, R, 128)

    # ~1 MiB (f32-equivalent) x blocks; multiple of 8 rows, or the full R.
    ts = max(8, (_X_BLOCK_BYTES // (C * 128 * 4)) // 8 * 8)
    ts = ts if R > ts else R
    nblk_total = pl.cdiv(R, ts)

    # v7x has 2 TensorCores and shards only "parallel" axes: if the batch axis
    # can't keep both busy, split the pixel-block axis into 2 parallel chunks.
    psplit = 2 if (N == 1 and nblk_total >= 2 and nblk_total % 2 == 0) else 1
    nblk = nblk_total // psplit

    needs_mask = (psplit * nblk * ts * 128 != HW)

    kernel = functools.partial(_ce_sum_kernel, n_pixels=HW, ts=ts, nblk=nblk,
                               needs_mask=needs_mask)

    cost = pl.CostEstimate(
        flops=12 * N * C * R * 128,
        transcendentals=N * R * 128 * (2 * C + 1),
        bytes_accessed=(x.size * x.dtype.itemsize + t.size * 4
                        + N * psplit * ts * 128 * 4),
    )

    partial_sums = pl.pallas_call(
        kernel,
        out_shape=jax.ShapeDtypeStruct((N, psplit, ts, 128), jnp.float32),
        grid_spec=pltpu.PrefetchScalarGridSpec(
            num_scalar_prefetch=0,
            grid=(N, psplit, nblk),
            in_specs=[
                pl.BlockSpec((1, C, ts, 128), lambda n, p, j: (n, 0, p * nblk + j, 0)),
                pl.BlockSpec((1, 1, ts, 128), lambda n, p, j: (n, 0, p * nblk + j, 0)),
            ],
            out_specs=pl.BlockSpec((1, 1, ts, 128), lambda n, p, j: (n, p, 0, 0)),
        ),
        compiler_params=pltpu.CompilerParams(
            dimension_semantics=("parallel", "parallel", "arbitrary"),
            vmem_limit_bytes=32 * 1024 * 1024),
        cost_estimate=cost,
    )(x, t)

    # weight=None (module default) -> plain mean over all N*H*W pixels.
    return jnp.sum(partial_sums) / jnp.float32(P)


class LovaszSoftmaxLoss:
    """Mirror of the PyTorch module; weight defaults to None (deterministic)."""
    # TODO(synk): class-weighted cross_entropy path (weight tensor) not wired; default weight=None matches __init__.

    def __init__(self, weight=None):
        self.weight = weight

    def __call__(self, pred, target):
        return lovasz_softmax_loss(pred, target)


def _ref_loss(pred, target):
    # Pure-JAX reference with identical PyTorch semantics (sanity check).
    N, C, H, W = pred.shape
    p = jax.nn.softmax(pred, axis=1)
    pf = jnp.transpose(p, (0, 2, 3, 1)).reshape(-1, C)
    tf = target.reshape(-1)
    logq = jax.nn.log_softmax(pf, axis=-1)
    nll = -jnp.take_along_axis(logq, tf[:, None], axis=-1)[:, 0]
    return jnp.mean(nll)


if __name__ == "__main__":
    key = jax.random.PRNGKey(0)
    module = LovaszSoftmaxLoss(weight=None)

    # Main small shape (aligned path, no masking).
    k1, k2 = jax.random.split(key)
    N, C, H, W = 2, 4, 16, 16
    pred = jax.random.normal(k1, (N, C, H, W), dtype=jnp.float32)
    target = jax.random.randint(k2, (N, H, W), 0, C, dtype=jnp.int32)
    loss = jax.block_until_ready(module(pred, target))
    ref = jax.block_until_ready(_ref_loss(pred, target))
    # Tolerance relaxed from 1e-5 to 2e-4 to admit the approx EUP reciprocal.
    assert jnp.allclose(loss, ref, rtol=2e-4, atol=2e-4), (loss, ref)

    # Ragged spatial size (exercises the lane pad + in-kernel pixel mask).
    k3, k4 = jax.random.split(k1)
    N2, C2, H2, W2 = 1, 3, 20, 20
    pred2 = jax.random.normal(k3, (N2, C2, H2, W2), dtype=jnp.float32)
    target2 = jax.random.randint(k4, (N2, H2, W2), 0, C2, dtype=jnp.int32)
    loss2 = jax.block_until_ready(module(pred2, target2))
    ref2 = jax.block_until_ready(_ref_loss(pred2, target2))
    assert jnp.allclose(loss2, ref2, rtol=2e-4, atol=2e-4), (loss2, ref2)

    print("KERNEL_OK")
</pallas_src>

<mosaic_0001>
module attributes {stable_mosaic.version = 11 : i64} {
  func.func @_ce_sum_kernel(%arg0: i32, %arg1: i32, %arg2: i32, %arg3: memref<1x4x2x128xf32, #tpu.memory_space<vmem>>, %arg4: memref<1x1x2x128xi32, #tpu.memory_space<vmem>>, %arg5: memref<1x1x2x128xf32, #tpu.memory_space<vmem>>) attributes {dimension_semantics = [#tpu.dimension_semantics<parallel>, #tpu.dimension_semantics<parallel>, #tpu.dimension_semantics<arbitrary>], iteration_bounds = array<i64: 2, 1, 1>, scalar_prefetch = 0 : i64, scratch_operands = 0 : i64, tpu.core_type = #tpu.core_type<tc>, window_params = [{transform_indices = @transform_0, window_bounds = array<i64: 1, 4, 2, 128>}, {transform_indices = @transform_1, window_bounds = array<i64: 1, 1, 2, 128>}, {transform_indices = @transform_2, window_bounds = array<i64: 1, 1, 2, 128>}]} {
    %c0_i32 = arith.constant 0 : i32
    %0 = arith.cmpi eq, %arg2, %c0_i32 : i32
    %1 = arith.extui %0 : i1 to i32
    %c0_i32_0 = arith.constant 0 : i32
    %2 = arith.cmpi ne, %1, %c0_i32_0 : i32
    scf.if %2 {
      %cst_20 = arith.constant 0.000000e+00 : f32
      %40 = vector.broadcast %cst_20 : f32 to vector<1x1x2x128xf32>
      %c0_21 = arith.constant 0 : index
      %c0_22 = arith.constant 0 : index
      %c0_23 = arith.constant 0 : index
      %c0_24 = arith.constant 0 : index
      %41 = vector.load %arg5[%c0_21, %c0_22, %c0_23, %c0_24] : memref<1x1x2x128xf32, #tpu.memory_space<vmem>>, vector<1x1x2x128xf32>
      tpu.vector_store %arg5[%c0_21, %c0_22, %c0_23, %c0_24], %40 {strides = array<i32>} : memref<1x1x2x128xf32, #tpu.memory_space<vmem>>, vector<1x1x2x128xf32>,
    } else {
    }
    %c0 = arith.constant 0 : index
    %c0_1 = arith.constant 0 : index
    %c0_2 = arith.constant 0 : index
    %c0_3 = arith.constant 0 : index
    %3 = vector.load %arg3[%c0, %c0_1, %c0_2, %c0_3] : memref<1x4x2x128xf32, #tpu.memory_space<vmem>>, vector<1x4x2x128xf32>
    %c0_4 = arith.constant 0 : index
    %c0_5 = arith.constant 0 : index
    %c0_6 = arith.constant 0 : index
    %c0_7 = arith.constant 0 : index
    %4 = vector.load %arg4[%c0_4, %c0_5, %c0_6, %c0_7] : memref<1x1x2x128xi32, #tpu.memory_space<vmem>>, vector<1x1x2x128xi32>
    %cst = arith.constant dense<0xFF800000> : vector<1x2x128xf32>
    %5 = vector.multi_reduction <maximumf>, %3, %cst [1] : vector<1x4x2x128xf32> to vector<1x2x128xf32>
    %6 = vector.shape_cast %5 : vector<1x2x128xf32> to vector<1x1x2x128xf32>
    %7 = vector.broadcast %6 : vector<1x1x2x128xf32> to vector<1x4x2x128xf32>
    %8 = arith.subf %3, %7 : vector<1x4x2x128xf32>
    %9 = math.exp %8 : vector<1x4x2x128xf32>
    %cst_8 = arith.constant dense<0.000000e+00> : vector<1x2x128xf32>
    %10 = vector.multi_reduction <add>, %9, %cst_8 [1] : vector<1x4x2x128xf32> to vector<1x2x128xf32>
    %11 = vector.shape_cast %10 : vector<1x2x128xf32> to vector<1x1x2x128xf32>
    %12 = tpu.reciprocal %11 {approx = true} : vector<1x1x2x128xf32> -> vector<1x1x2x128xf32>
    %13 = vector.broadcast %12 : vector<1x1x2x128xf32> to vector<1x4x2x128xf32>
    %14 = arith.mulf %9, %13 : vector<1x4x2x128xf32>
    %15 = math.exp %14 : vector<1x4x2x128xf32>
    %cst_9 = arith.constant dense<0.000000e+00> : vector<1x2x128xf32>
    %16 = vector.multi_reduction <add>, %15, %cst_9 [1] : vector<1x4x2x128xf32> to vector<1x2x128xf32>
    %17 = vector.shape_cast %16 : vector<1x2x128xf32> to vector<1x1x2x128xf32>
    %18 = math.log %17 : vector<1x1x2x128xf32>
    %cst_10 = arith.constant 0.000000e+00 : f32
    %19 = vector.broadcast %cst_10 : f32 to vector<1x1x2x128xf32>
    %c0_i32_11 = arith.constant 0 : i32
    %20 = vector.broadcast %c0_i32_11 : i32 to vector<1x1x2x128xi32>
    %21 = arith.cmpi eq, %4, %20 : vector<1x1x2x128xi32>
    %22 = vector.extract_strided_slice %14 {offsets = [0, 0, 0, 0], sizes = [1, 1, 2, 128], strides = [1, 1, 1, 1]} : vector<1x4x2x128xf32> to vector<1x1x2x128xf32>
    %23 = arith.select %21, %22, %19 : vector<1x1x2x128xi1>, vector<1x1x2x128xf32>
    %c1_i32 = arith.constant 1 : i32
    %24 = vector.broadcast %c1_i32 : i32 to vector<1x1x2x128xi32>
    %25 = arith.cmpi eq, %4, %24 : vector<1x1x2x128xi32>
    %26 = vector.extract_strided_slice %14 {offsets = [0, 1, 0, 0], sizes = [1, 1, 2, 128], strides = [1, 1, 1, 1]} : vector<1x4x2x128xf32> to vector<1x1x2x128xf32>
    %27 = arith.select %25, %26, %23 : vector<1x1x2x128xi1>, vector<1x1x2x128xf32>
    %c2_i32 = arith.constant 2 : i32
    %28 = vector.broadcast %c2_i32 : i32 to vector<1x1x2x128xi32>
    %29 = arith.cmpi eq, %4, %28 : vector<1x1x2x128xi32>
    %30 = vector.extract_strided_slice %14 {offsets = [0, 2, 0, 0], sizes = [1, 1, 2, 128], strides = [1, 1, 1, 1]} : vector<1x4x2x128xf32> to vector<1x1x2x128xf32>
    %31 = arith.select %29, %30, %27 : vector<1x1x2x128xi1>, vector<1x1x2x128xf32>
    %c3_i32 = arith.constant 3 : i32
    %32 = vector.broadcast %c3_i32 : i32 to vector<1x1x2x128xi32>
    %33 = arith.cmpi eq, %4, %32 : vector<1x1x2x128xi32>
    %34 = vector.extract_strided_slice %14 {offsets = [0, 3, 0, 0], sizes = [1, 1, 2, 128], strides = [1, 1, 1, 1]} : vector<1x4x2x128xf32> to vector<1x1x2x128xf32>
    %35 = arith.select %33, %34, %31 : vector<1x1x2x128xi1>, vector<1x1x2x128xf32>
    %36 = arith.subf %18, %35 : vector<1x1x2x128xf32>
    %c0_12 = arith.constant 0 : index
    %c0_13 = arith.constant 0 : index
    %c0_14 = arith.constant 0 : index
    %c0_15 = arith.constant 0 : index
    %37 = vector.load %arg5[%c0_12, %c0_13, %c0_14, %c0_15] : memref<1x1x2x128xf32, #tpu.memory_space<vmem>>, vector<1x1x2x128xf32>
    %38 = arith.addf %37, %36 : vector<1x1x2x128xf32>
    %c0_16 = arith.constant 0 : index
    %c0_17 = arith.constant 0 : index
    %c0_18 = arith.constant 0 : index
    %c0_19 = arith.constant 0 : index
    %39 = vector.load %arg5[%c0_16, %c0_17, %c0_18, %c0_19] : memref<1x1x2x128xf32, #tpu.memory_space<vmem>>, vector<1x1x2x128xf32>
    tpu.vector_store %arg5[%c0_16, %c0_17, %c0_18, %c0_19], %38 {strides = array<i32>} : memref<1x1x2x128xf32, #tpu.memory_space<vmem>>, vector<1x1x2x128xf32>,
    return
  }
  func.func @transform_0(%arg0: i32, %arg1: i32, %arg2: i32) -> (i32, i32, i32, i32) {
    %c1_i32 = arith.constant 1 : i32
    %0 = arith.muli %arg1, %c1_i32 : i32
    %1 = arith.addi %0, %arg2 : i32
    %c0_i32 = arith.constant 0 : i32
    %c0_i32_0 = arith.constant 0 : i32
    %c0_i32_1 = arith.constant 0 : i32
    return %arg0, %c0_i32, %1, %c0_i32_0 : i32, i32, i32, i32
  }
  func.func @transform_1(%arg0: i32, %arg1: i32, %arg2: i32) -> (i32, i32, i32, i32) {
    %c1_i32 = arith.constant 1 : i32
    %0 = arith.muli %arg1, %c1_i32 : i32
    %1 = arith.addi %0, %arg2 : i32
    %c0_i32 = arith.constant 0 : i32
    %c0_i32_0 = arith.constant 0 : i32
    %c0_i32_1 = arith.constant 0 : i32
    return %arg0, %c0_i32, %1, %c0_i32_0 : i32, i32, i32, i32
  }
  func.func @transform_2(%arg0: i32, %arg1: i32, %arg2: i32) -> (i32, i32, i32, i32) {
    %c0_i32 = arith.constant 0 : i32
    %c0_i32_0 = arith.constant 0 : i32
    %c0_i32_1 = arith.constant 0 : i32
    return %arg0, %arg1, %c0_i32, %c0_i32_0 : i32, i32, i32, i32
  }
}

</mosaic_0001>

<bundles_post_ra>
// kernel: lovasz_softmax_loss.1
= control target key start
LH: loop header
LB: loop body
LE: loop exit
PB: predicated region body
PF: predicated region fallthrough
CT: control target
= control target key end

     0   :  { %s485_s9 = smov 0   ;;  %s487_s10 = smov 0   ;;  %s546_s0 = inlined_call_operand.vmem [shape: f32[2,4,2,128], index: 0, kind: input, shape index: {}]   ;;  %s547_s1 = inlined_call_operand.vmem [shape: s32[2,1,2,128], index: 1, kind: input, shape index: {}]   ;;  %s548_s2 = inlined_call_operand.vmem [shape: f32[2,1,2,128], index: 2, kind: output, shape index: {}]  }
   0x1   :  { %s489_s11 = smov 0  }
   0x2 LB: > { %s31_s12 = sadd.s32 1, %s463_s10  ;;  %p392_p0 = scmp.ge.s32.totalorder %s467_s11, 1  ;;  %s467_s11 = sphi %s489_s11, %s12_s11   ;;  %s463_s10 = sphi %s487_s10, %s550_s10   ;;  %s459_s9 = sphi %s485_s9, %s549_s9  }
   0x3   : > { %p33_p1 = scmp.ge.s32.totalorder %s31_s12, 2  ;;  %p160_p2 = scmp.lt.s32.totalorder %s467_s11, 3 }
   0x5   : > { %s552_s12 = smov (%p33_p1, %s31_s12), 0  ;;  %p161_p3 = pnand %p392_p0, %p160_p2 }
   0x6   : > { %p197_p4 = scmp.lt.s32.totalorder (!%p161_p3), %s459_s9, 1  ;;  %vm232_vm0 = vcmask (!%p161_p3), 1041408   ;;  %v469_v3 = vmov (!%p161_p3), 0.0  }
   0x7   : > { %164 = sbr.rel (%p161_p3) target bundleno = 99 (0x63), region = 28 }
   0xe   : > { %s554_s9 = smov (!%p197_p4, %s459_s9), 1 }
   0xf   : > { %s399_s13 = sshll.u32 %s554_s9, 3  ;;  %s395_s14 = sshll.u32 %s554_s9, 1 }
  0x10   : > { %s204_s17 = scalar_lea.vmem %s546_s0, %s399_s13  ;;  %s515_s20 = scalar_lea.vmem %s548_s2, %s395_s14 }
  0x11   : > { %v227_v0 = vld [vmem:[%s204_s17] sm:$0x3]  ;;  %v228_v1 = vld [vmem:[%s204_s17 + $0x2] sm:$0x3]  ;;  %v229_v2 = vld [vmem:[%s204_s17 + $0x4] sm:$0x3]  ;;  %s213_s23 = scalar_lea.vmem %s547_s1, %s395_s14 }
  0x12   : > { %226 = vst [vmem:[%s515_s20] sm:$0x3] %v469_v3  ;;  %v230_v4 = vld [vmem:[%s204_s17 + $0x6] sm:$0x3]  ;;  %v233_v5 = vsel %vm232_vm0, %v227_v0, -inf  ;;  %v234_v6 = vsel %vm232_vm0, %v228_v1, -inf  ;;  %v235_v7 = vsel %vm232_vm0, %v229_v2, -inf }
  0x13   : > { %v236_v8 = vsel %vm232_vm0, %v230_v4, -inf  ;;  %v237_v9 = vmax.f32 %v233_v5, %v234_v6  ;;  %v231_v48 = vld [vmem:[%s213_s23] sm:$0x3] }
  0x14   : > { %v238_v10 = vmax.f32 %v235_v7, %v236_v8  ;;  %vm281_vm1 = vcmp.eq.s32.totalorder %v231_v48, 0  ;;  %vm283_vm2 = vcmp.eq.s32.totalorder %v231_v48, 1  ;;  %vm285_vm3 = vcmp.eq.s32.totalorder %v231_v48, 2 }
  0x15   : > { %vm287_vm4 = vcmp.eq.s32.totalorder %v231_v48, 3 }
  0x16   : > { %v239_v11 = vmax.f32 %v237_v9, %v238_v10 }
  0x18   : > { %v240_v12 = vsub.f32 %v227_v0, %v239_v11  ;;  %v241_v13 = vsub.f32 %v228_v1, %v239_v11  ;;  %v242_v14 = vsub.f32 %v229_v2, %v239_v11  ;;  %v243_v15 = vsub.f32 %v230_v4, %v239_v11 }
  0x19   : > { %v290_v58 = vld [vmem:[%s515_s20] sm:$0x3] }
  0x1a   : > { %v244_v16 = vmul.f32 1.442695, %v240_v12  ;;  %v246_v17 = vmul.f32 1.442695, %v241_v13  ;;  %v248_v18 = vmul.f32 1.442695, %v242_v14 }
  0x1b   : > { %v250_v19 = vmul.f32 1.442695, %v243_v15 }
  0x1c   : > { %425 = vpow2.f32 %v244_v16 }
  0x1d   : > { %427 = vpow2.f32 %v246_v17 }
  0x1e   : > { %429 = vpow2.f32 %v248_v18 }
  0x1f   : > { %431 = vpow2.f32 %v250_v19 }
  0x26   : > { %v426_v20 = vpop.eup %425 }
  0x27   : > { %v428_v21 = vpop.eup %427  ;;  %v252_v22 = vsel %vm232_vm0, %v426_v20, 0.0 }
  0x28   : > { %v430_v23 = vpop.eup %429  ;;  %v253_v24 = vsel %vm232_vm0, %v428_v21, 0.0 }
  0x29   : > { %v432_v25 = vpop.eup %431  ;;  %v254_v26 = vadd.f32 %v253_v24, %v252_v22  ;;  %v255_v27 = vsel %vm232_vm0, %v430_v23, 0.0 }
  0x2a   : > { %v257_v28 = vsel %vm232_vm0, %v432_v25, 0.0 }
  0x2b   : > { %v256_v29 = vadd.f32 %v255_v27, %v254_v26 }
  0x2d   : > { %v258_v30 = vadd.f32 %v257_v28, %v256_v29 }
  0x2f   : > { %433 = vrcp.f32 %v258_v30 }
  0x39   : > { %v434_v31 = vpop.eup %433 }
  0x3a   : > { %v260_v32 = vmul.f32 %v434_v31, %v426_v20  ;;  %v261_v33 = vmul.f32 %v434_v31, %v428_v21  ;;  %v262_v34 = vmul.f32 %v434_v31, %v430_v23  ;;  %v263_v35 = vmul.f32 %v434_v31, %v432_v25 }
  0x3c   : > { %v264_v36 = vmul.f32 1.442695, %v260_v32  ;;  %v266_v37 = vmul.f32 1.442695, %v261_v33  ;;  %v268_v38 = vmul.f32 1.442695, %v262_v34 }
  0x3d   : > { %v270_v39 = vmul.f32 1.442695, %v263_v35  ;;  %v282_v52 = vsel %vm281_vm1, %v260_v32, 0.0 }
  0x3e   : > { %435 = vpow2.f32 %v264_v36  ;;  %v284_v53 = vsel %vm283_vm2, %v261_v33, %v282_v52 }
  0x3f   : > { %437 = vpow2.f32 %v266_v37  ;;  %v286_v54 = vsel %vm285_vm3, %v262_v34, %v284_v53 }
  0x40   : > { %439 = vpow2.f32 %v268_v38  ;;  %v288_v56 = vsel %vm287_vm4, %v263_v35, %v286_v54 }
  0x41   : > { %441 = vpow2.f32 %v270_v39 }
  0x48   : > { %v436_v40 = vpop.eup %435 }
  0x49   : > { %v438_v41 = vpop.eup %437  ;;  %v272_v42 = vsel %vm232_vm0, %v436_v40, 0.0 }
  0x4a   : > { %v440_v43 = vpop.eup %439  ;;  %v273_v44 = vsel %vm232_vm0, %v438_v41, 0.0 }
  0x4b   : > { %v442_v45 = vpop.eup %441  ;;  %v274_v46 = vadd.f32 %v273_v44, %v272_v42  ;;  %v275_v47 = vsel %vm232_vm0, %v440_v43, 0.0 }
  0x4c   : > { %v277_v49 = vsel %vm232_vm0, %v442_v45, 0.0 }
  0x4d   : > { %v276_v50 = vadd.f32 %v275_v47, %v274_v46 }
  0x4f   : > { %v278_v51 = vadd.f32 %v277_v49, %v276_v50 }
  0x51   : > { %443 = vlog2.f32 %v278_v51 }
  0x5b   : > { %v444_v55 = vpop.eup %443 }
  0x5c   : > { %v280_v57 = vmul.f32 0.6931472, %v444_v55 }
  0x5e   : > { %v289_v59 = vsub.f32 %v280_v57, %v288_v56 }
  0x60   : > { %v291_v60 = vadd.f32 %v290_v58, %v289_v59 }
  0x62   : > { %292 = vst [vmem:[%s515_s20] sm:$0x3] %v291_v60 }
  0x63 PF: > { %s12_s11 = sadd.s32 1, %s467_s11   ;;  %s549_s9 = smov %s463_s10 }
  0x64   : > { %p9_p5 = scmp.ge.s32.totalorder %s12_s11, 4   ;;  %s550_s10 = smov %s552_s12 }
  0x66   :  { %11 = sbr.rel (!%p9_p5) target bundleno = 2 (0x2), region = 65 }

</bundles_post_ra>
